<compile_context>
chip_gen: v7x
topology: tpu7x:2x2x1
jax: 0.10.0
libtpu: 0.0.40
codegen_flags: <defaults>
</compile_context>

<pallas_src>
import jax
import jax.numpy as jnp
import numpy as np
from jax import lax
from jax.experimental import pallas as pl
from jax.experimental.pallas import tpu as pltpu

BN_EPS = 1e-5


def _make_kernel(L, Lp):
    """Kernel closure over the static per-sample length L and padded length Lp."""

    def kernel(x_ref, w1_ref, w2_ref, b1_ref, b2_ref, out_ref):
        # x_ref:   (Cin, W)      W = Nb * Lp, lane-dense slab (zero padded per sample)
        # w1_ref:  (3, P, Cin)   conv1 taps (BN1 scale folded in)
        # w2_ref:  (3, P, P)     conv2 taps (BN2 scale folded in)
        # b*_ref:  (P, 1)        folded BN shifts
        # out_ref: (P, W)
        W = out_ref.shape[-1]

        x = x_ref[...]                                   # (Cin, W)
        # neighbor taps via XLU rotations; wrapped / cross-sample lanes land in
        # each sample's zero-padded tail (Lp > L), so no extra masking needed.
        x_l = pltpu.roll(x, shift=1, axis=1)             # x[j-1]
        x_r = pltpu.roll(x, shift=W - 1, axis=1)         # x[j+1]

        # conv1 (k=3, stride=1, pad=1, no bias) + folded BN1 + ReLU
        h = (jnp.dot(w1_ref[0], x_l, preferred_element_type=jnp.float32)
             + jnp.dot(w1_ref[1], x, preferred_element_type=jnp.float32)
             + jnp.dot(w1_ref[2], x_r, preferred_element_type=jnp.float32))
        h = jnp.maximum(h + b1_ref[...], 0.0)

        # zero the per-sample padding lanes so conv2's neighbor taps see zeros
        lane = lax.broadcasted_iota(jnp.int32, (1, W), 1)
        valid = (lane % Lp) < L
        h = jnp.where(valid, h, 0.0)

        h_l = pltpu.roll(h, shift=1, axis=1)
        h_r = pltpu.roll(h, shift=W - 1, axis=1)

        # conv2 + folded BN2 + ReLU
        o = (jnp.dot(w2_ref[0], h_l, preferred_element_type=jnp.float32)
             + jnp.dot(w2_ref[1], h, preferred_element_type=jnp.float32)
             + jnp.dot(w2_ref[2], h_r, preferred_element_type=jnp.float32))
        o = jnp.maximum(o + b2_ref[...], 0.0)
        out_ref[...] = o.astype(out_ref.dtype)

    return kernel


def basic_block_1d(x, w1, w2, bn1, bn2):
    """x: (N, Cin, L) f32.  w1: (P, Cin, 3), w2: (P, P, 3).
    bn1/bn2: dicts with gamma, beta, mean, var of shape (P,).  stride=1."""
    N, Cin, L = x.shape
    P = w1.shape[0]

    # Lane-dense padded length; Lp >= L + 1 so every sample has a zero tail
    # (gives zero left/right conv taps for free, incl. across sample borders).
    Lp = pl.cdiv(L + 1, 128) * 128

    # Fold eval-mode BN: scale into conv weights, keep only per-channel shift.
    s1 = bn1["gamma"] / jnp.sqrt(bn1["var"] + BN_EPS)
    b1 = (bn1["beta"] - bn1["mean"] * s1).reshape(P, 1).astype(jnp.float32)
    s2 = bn2["gamma"] / jnp.sqrt(bn2["var"] + BN_EPS)
    b2 = (bn2["beta"] - bn2["mean"] * s2).reshape(P, 1).astype(jnp.float32)
    # (P, Cin, 3) -> (3, P, Cin) so the kernel indexes taps on the leading axis.
    w1f = (jnp.transpose(w1, (2, 0, 1)) * s1[None, :, None]).astype(jnp.float32)
    w2f = (jnp.transpose(w2, (2, 0, 1)) * s2[None, :, None]).astype(jnp.float32)

    # Layout: channels -> sublanes, batch*padded-length -> lanes.
    x_slab = jnp.transpose(x, (1, 0, 2))                      # (Cin, N, L)
    x_slab = jnp.pad(x_slab, ((0, 0), (0, 0), (0, Lp - L)))   # (Cin, N, Lp)
    x_slab = x_slab.reshape(Cin, N * Lp)                      # (Cin, N*Lp)

    # Samples per grid step: target ~1024 lanes per step, but keep >=2 steps
    # when possible so both v7x TensorCores get work via the parallel axis.
    nb = max(1, min(N, 1024 // Lp))
    while N % nb:
        nb -= 1
    if N > 1 and N // nb < 2:
        nb = max(1, N // 2)
        while N % nb:
            nb -= 1
    W_blk = nb * Lp
    grid = (N // nb,)

    out_slab = pl.pallas_call(
        _make_kernel(L, Lp),
        out_shape=jax.ShapeDtypeStruct((P, N * Lp), x.dtype),
        grid_spec=pltpu.PrefetchScalarGridSpec(
            num_scalar_prefetch=0,
            grid=grid,
            in_specs=[
                pl.BlockSpec((Cin, W_blk), lambda b: (0, b)),
                pl.BlockSpec((3, P, Cin), lambda b: (0, 0, 0)),
                pl.BlockSpec((3, P, P), lambda b: (0, 0, 0)),
                pl.BlockSpec((P, 1), lambda b: (0, 0)),
                pl.BlockSpec((P, 1), lambda b: (0, 0)),
            ],
            out_specs=pl.BlockSpec((P, W_blk), lambda b: (0, b)),
        ),
        compiler_params=pltpu.CompilerParams(
            dimension_semantics=("parallel",)),
    )(x_slab, w1f, w2f, b1, b2)

    # (P, N*Lp) -> (N, P, L)
    out = out_slab.reshape(P, N, Lp)[:, :, :L]
    return jnp.transpose(out, (1, 0, 2))


def _reference(x, w1, w2, bn1, bn2):
    """Pure-JAX reference (NCL conv + eval-mode BN + ReLU)."""
    dn = lax.conv_dimension_numbers(x.shape, w1.shape, ("NCH", "OIH", "NCH"))

    def conv(inp, w):
        return lax.conv_general_dilated(inp, w, window_strides=(1,),
                                        padding=((1, 1),),
                                        dimension_numbers=dn)

    def bn(inp, p):
        scale = p["gamma"] / jnp.sqrt(p["var"] + BN_EPS)
        shift = p["beta"] - p["mean"] * scale
        return inp * scale[None, :, None] + shift[None, :, None]

    h = jax.nn.relu(bn(conv(x, w1), bn1))
    return jax.nn.relu(bn(conv(h, w2), bn2))


if __name__ == "__main__":
    N, Cin, P, L = 2, 4, 8, 16  # batch, inplanes, planes, seq length

    key = jax.random.PRNGKey(0)
    k = jax.random.split(key, 9)
    x = jax.random.normal(k[0], (N, Cin, L), dtype=jnp.float32)
    w1 = jax.random.normal(k[1], (P, Cin, 3), dtype=jnp.float32) * 0.2
    w2 = jax.random.normal(k[2], (P, P, 3), dtype=jnp.float32) * 0.2
    bn1 = dict(gamma=jax.random.uniform(k[3], (P,), minval=0.5, maxval=1.5),
               beta=jax.random.normal(k[4], (P,)) * 0.1,
               mean=jax.random.normal(k[5], (P,)) * 0.1,
               var=jax.random.uniform(k[6], (P,), minval=0.5, maxval=1.5))
    bn2 = dict(gamma=jax.random.uniform(k[7], (P,), minval=0.5, maxval=1.5),
               beta=jax.random.normal(k[8], (P,)) * 0.1,
               mean=jnp.zeros((P,), jnp.float32),
               var=jnp.ones((P,), jnp.float32))

    out = basic_block_1d(x, w1, w2, bn1, bn2)
    out = jax.block_until_ready(out)

    ref = _reference(x, w1, w2, bn1, bn2)
    np.testing.assert_allclose(np.asarray(out), np.asarray(ref),
                               rtol=1e-4, atol=1e-4)
    print("KERNEL_OK")
</pallas_src>

<mosaic_0001>
module attributes {stable_mosaic.version = 11 : i64} {
  func.func @kernel(%arg0: i32, %arg1: memref<4x128xf32, #tpu.memory_space<vmem>>, %arg2: memref<3x8x4xf32, #tpu.memory_space<vmem>>, %arg3: memref<3x8x8xf32, #tpu.memory_space<vmem>>, %arg4: memref<8x1xf32, #tpu.memory_space<vmem>>, %arg5: memref<8x1xf32, #tpu.memory_space<vmem>>, %arg6: memref<8x128xf32, #tpu.memory_space<vmem>>) attributes {dimension_semantics = [#tpu.dimension_semantics<parallel>], iteration_bounds = array<i64: 2>, scalar_prefetch = 0 : i64, scratch_operands = 0 : i64, tpu.core_type = #tpu.core_type<tc>, window_params = [{transform_indices = @transform_0, window_bounds = array<i64: 4, 128>}, {pipeline_mode = #tpu.pipeline_mode<synchronous>, transform_indices = @transform_1, window_bounds = array<i64: 3, 8, 4>}, {pipeline_mode = #tpu.pipeline_mode<synchronous>, transform_indices = @transform_2, window_bounds = array<i64: 3, 8, 8>}, {pipeline_mode = #tpu.pipeline_mode<synchronous>, transform_indices = @transform_3, window_bounds = array<i64: 8, 1>}, {pipeline_mode = #tpu.pipeline_mode<synchronous>, transform_indices = @transform_4, window_bounds = array<i64: 8, 1>}, {transform_indices = @transform_5, window_bounds = array<i64: 8, 128>}]} {
    %c0 = arith.constant 0 : index
    %c0_0 = arith.constant 0 : index
    %0 = vector.load %arg1[%c0, %c0_0] : memref<4x128xf32, #tpu.memory_space<vmem>>, vector<4x128xf32>
    %c1_i32 = arith.constant 1 : i32
    %1 = tpu.dynamic_rotate %0 by %c1_i32 dim 1 : vector<4x128xf32>, i32 -> vector<4x128xf32>
    %c127_i32 = arith.constant 127 : i32
    %2 = tpu.dynamic_rotate %0 by %c127_i32 dim 1 : vector<4x128xf32>, i32 -> vector<4x128xf32>
    %c0_1 = arith.constant 0 : index
    %c0_2 = arith.constant 0 : index
    %c0_3 = arith.constant 0 : index
    %3 = vector.load %arg2[%c0_1, %c0_2, %c0_3] : memref<3x8x4xf32, #tpu.memory_space<vmem>>, vector<1x8x4xf32>
    %4 = vector.shape_cast %3 : vector<1x8x4xf32> to vector<8x4xf32>
    %cst = arith.constant dense<0.000000e+00> : vector<8x128xf32>
    %5 = tpu.matmul %4, %1, %cst {dimension_numbers = #tpu.dot_dimension_numbers<[1], [0], [0], [1], [0, 0, 1, 1], [], []>} : vector<8x4xf32>, vector<4x128xf32>, vector<8x128xf32> -> vector<8x128xf32>
    %c1 = arith.constant 1 : index
    %c0_4 = arith.constant 0 : index
    %c0_5 = arith.constant 0 : index
    %6 = vector.load %arg2[%c1, %c0_4, %c0_5] : memref<3x8x4xf32, #tpu.memory_space<vmem>>, vector<1x8x4xf32>
    %7 = vector.shape_cast %6 : vector<1x8x4xf32> to vector<8x4xf32>
    %cst_6 = arith.constant dense<0.000000e+00> : vector<8x128xf32>
    %8 = tpu.matmul %7, %0, %cst_6 {dimension_numbers = #tpu.dot_dimension_numbers<[1], [0], [0], [1], [0, 0, 1, 1], [], []>} : vector<8x4xf32>, vector<4x128xf32>, vector<8x128xf32> -> vector<8x128xf32>
    %9 = arith.addf %5, %8 : vector<8x128xf32>
    %c2 = arith.constant 2 : index
    %c0_7 = arith.constant 0 : index
    %c0_8 = arith.constant 0 : index
    %10 = vector.load %arg2[%c2, %c0_7, %c0_8] : memref<3x8x4xf32, #tpu.memory_space<vmem>>, vector<1x8x4xf32>
    %11 = vector.shape_cast %10 : vector<1x8x4xf32> to vector<8x4xf32>
    %cst_9 = arith.constant dense<0.000000e+00> : vector<8x128xf32>
    %12 = tpu.matmul %11, %2, %cst_9 {dimension_numbers = #tpu.dot_dimension_numbers<[1], [0], [0], [1], [0, 0, 1, 1], [], []>} : vector<8x4xf32>, vector<4x128xf32>, vector<8x128xf32> -> vector<8x128xf32>
    %13 = arith.addf %9, %12 : vector<8x128xf32>
    %c0_10 = arith.constant 0 : index
    %c0_11 = arith.constant 0 : index
    %14 = vector.load %arg4[%c0_10, %c0_11] : memref<8x1xf32, #tpu.memory_space<vmem>>, vector<8x1xf32>
    %15 = vector.broadcast %14 : vector<8x1xf32> to vector<8x128xf32>
    %16 = arith.addf %13, %15 : vector<8x128xf32>
    %cst_12 = arith.constant 0.000000e+00 : f32
    %17 = vector.broadcast %cst_12 : f32 to vector<8x128xf32>
    %18 = arith.maximumf %16, %17 : vector<8x128xf32>
    %19 = tpu.iota {dimensions = array<i32: 1>} : vector<1x128xi32>
    %c128_i32 = arith.constant 128 : i32
    %c0_i32 = arith.constant 0 : i32
    %20 = arith.cmpi eq, %c128_i32, %c0_i32 : i32
    %c1_i32_13 = arith.constant 1 : i32
    %21 = arith.select %20, %c1_i32_13, %c128_i32 : i32
    %22 = vector.broadcast %21 : i32 to vector<1x128xi32>
    %23 = arith.remsi %19, %22 : vector<1x128xi32>
    %c0_i32_14 = arith.constant 0 : i32
    %24 = vector.broadcast %c0_i32_14 : i32 to vector<1x128xi32>
    %25 = arith.cmpi ne, %23, %24 : vector<1x128xi32>
    %c0_i32_15 = arith.constant 0 : i32
    %26 = vector.broadcast %c0_i32_15 : i32 to vector<1x128xi32>
    %27 = arith.cmpi slt, %23, %26 : vector<1x128xi32>
    %c0_i32_16 = arith.constant 0 : i32
    %28 = arith.cmpi slt, %21, %c0_i32_16 : i32
    %29 = vector.broadcast %28 : i1 to vector<1x128xi1>
    %30 = vector.broadcast %29 : vector<1x128xi1> to vector<1x128xi1>
    %31 = arith.xori %27, %30 : vector<1x128xi1>
    %32 = arith.andi %31, %25 : vector<1x128xi1>
    %33 = vector.broadcast %21 : i32 to vector<1x128xi32>
    %34 = arith.addi %23, %33 : vector<1x128xi32>
    %35 = arith.select %32, %34, %23 : vector<1x128xi1>, vector<1x128xi32>
    %c16_i32 = arith.constant 16 : i32
    %36 = vector.broadcast %c16_i32 : i32 to vector<1x128xi32>
    %37 = arith.cmpi slt, %35, %36 : vector<1x128xi32>
    %cst_17 = arith.constant 0.000000e+00 : f32
    %38 = vector.shape_cast %37 : vector<1x128xi1> to vector<1x128xi1>
    %39 = vector.broadcast %38 : vector<1x128xi1> to vector<8x128xi1>
    %40 = vector.broadcast %cst_17 : f32 to vector<8x128xf32>
    %41 = arith.select %39, %18, %40 : vector<8x128xi1>, vector<8x128xf32>
    %c1_i32_18 = arith.constant 1 : i32
    %42 = tpu.dynamic_rotate %41 by %c1_i32_18 dim 1 : vector<8x128xf32>, i32 -> vector<8x128xf32>
    %c127_i32_19 = arith.constant 127 : i32
    %43 = tpu.dynamic_rotate %41 by %c127_i32_19 dim 1 : vector<8x128xf32>, i32 -> vector<8x128xf32>
    %c0_20 = arith.constant 0 : index
    %c0_21 = arith.constant 0 : index
    %c0_22 = arith.constant 0 : index
    %44 = vector.load %arg3[%c0_20, %c0_21, %c0_22] : memref<3x8x8xf32, #tpu.memory_space<vmem>>, vector<1x8x8xf32>
    %45 = vector.shape_cast %44 : vector<1x8x8xf32> to vector<8x8xf32>
    %cst_23 = arith.constant dense<0.000000e+00> : vector<8x128xf32>
    %46 = tpu.matmul %45, %42, %cst_23 {dimension_numbers = #tpu.dot_dimension_numbers<[1], [0], [0], [1], [0, 0, 1, 1], [], []>} : vector<8x8xf32>, vector<8x128xf32>, vector<8x128xf32> -> vector<8x128xf32>
    %c1_24 = arith.constant 1 : index
    %c0_25 = arith.constant 0 : index
    %c0_26 = arith.constant 0 : index
    %47 = vector.load %arg3[%c1_24, %c0_25, %c0_26] : memref<3x8x8xf32, #tpu.memory_space<vmem>>, vector<1x8x8xf32>
    %48 = vector.shape_cast %47 : vector<1x8x8xf32> to vector<8x8xf32>
    %cst_27 = arith.constant dense<0.000000e+00> : vector<8x128xf32>
    %49 = tpu.matmul %48, %41, %cst_27 {dimension_numbers = #tpu.dot_dimension_numbers<[1], [0], [0], [1], [0, 0, 1, 1], [], []>} : vector<8x8xf32>, vector<8x128xf32>, vector<8x128xf32> -> vector<8x128xf32>
    %50 = arith.addf %46, %49 : vector<8x128xf32>
    %c2_28 = arith.constant 2 : index
    %c0_29 = arith.constant 0 : index
    %c0_30 = arith.constant 0 : index
    %51 = vector.load %arg3[%c2_28, %c0_29, %c0_30] : memref<3x8x8xf32, #tpu.memory_space<vmem>>, vector<1x8x8xf32>
    %52 = vector.shape_cast %51 : vector<1x8x8xf32> to vector<8x8xf32>
    %cst_31 = arith.constant dense<0.000000e+00> : vector<8x128xf32>
    %53 = tpu.matmul %52, %43, %cst_31 {dimension_numbers = #tpu.dot_dimension_numbers<[1], [0], [0], [1], [0, 0, 1, 1], [], []>} : vector<8x8xf32>, vector<8x128xf32>, vector<8x128xf32> -> vector<8x128xf32>
    %54 = arith.addf %50, %53 : vector<8x128xf32>
    %c0_32 = arith.constant 0 : index
    %c0_33 = arith.constant 0 : index
    %55 = vector.load %arg5[%c0_32, %c0_33] : memref<8x1xf32, #tpu.memory_space<vmem>>, vector<8x1xf32>
    %56 = vector.broadcast %55 : vector<8x1xf32> to vector<8x128xf32>
    %57 = arith.addf %54, %56 : vector<8x128xf32>
    %cst_34 = arith.constant 0.000000e+00 : f32
    %58 = vector.broadcast %cst_34 : f32 to vector<8x128xf32>
    %59 = arith.maximumf %57, %58 : vector<8x128xf32>
    %c0_35 = arith.constant 0 : index
    %c0_36 = arith.constant 0 : index
    %60 = vector.load %arg6[%c0_35, %c0_36] : memref<8x128xf32, #tpu.memory_space<vmem>>, vector<8x128xf32>
    tpu.vector_store %arg6[%c0_35, %c0_36], %59 {strides = array<i32>} : memref<8x128xf32, #tpu.memory_space<vmem>>, vector<8x128xf32>,
    return
  }
  func.func @transform_0(%arg0: i32) -> (i32, i32) {
    %c0_i32 = arith.constant 0 : i32
    %c0_i32_0 = arith.constant 0 : i32
    return %c0_i32, %arg0 : i32, i32
  }
  func.func @transform_1(%arg0: i32) -> (i32, i32, i32) {
    %c0_i32 = arith.constant 0 : i32
    %c0_i32_0 = arith.constant 0 : i32
    %c0_i32_1 = arith.constant 0 : i32
    %c0_i32_2 = arith.constant 0 : i32
    return %c0_i32, %c0_i32_0, %c0_i32_1 : i32, i32, i32
  }
  func.func @transform_2(%arg0: i32) -> (i32, i32, i32) {
    %c0_i32 = arith.constant 0 : i32
    %c0_i32_0 = arith.constant 0 : i32
    %c0_i32_1 = arith.constant 0 : i32
    %c0_i32_2 = arith.constant 0 : i32
    return %c0_i32, %c0_i32_0, %c0_i32_1 : i32, i32, i32
  }
  func.func @transform_3(%arg0: i32) -> (i32, i32) {
    %c0_i32 = arith.constant 0 : i32
    %c0_i32_0 = arith.constant 0 : i32
    %c0_i32_1 = arith.constant 0 : i32
    return %c0_i32, %c0_i32_0 : i32, i32
  }
  func.func @transform_4(%arg0: i32) -> (i32, i32) {
    %c0_i32 = arith.constant 0 : i32
    %c0_i32_0 = arith.constant 0 : i32
    %c0_i32_1 = arith.constant 0 : i32
    return %c0_i32, %c0_i32_0 : i32, i32
  }
  func.func @transform_5(%arg0: i32) -> (i32, i32) {
    %c0_i32 = arith.constant 0 : i32
    %c0_i32_0 = arith.constant 0 : i32
    return %c0_i32, %arg0 : i32, i32
  }
}

</mosaic_0001>

<bundles_post_ra>
// kernel: tpu_custom_call.1
= control target key start
LH: loop header
LB: loop body
LE: loop exit
PB: predicated region body
PF: predicated region fallthrough
CT: control target
= control target key end

     0   :  { %10 = vsyncpa [#allocation3], 0  ;;  %s1154_s0 = inlined_call_operand.vmem [shape: f32[4,256], index: 0, kind: input, shape index: {}]   ;;  %s1155_s1 = inlined_call_operand.vmem [shape: f32[3,8,4], index: 1, kind: input, shape index: {}]   ;;  %s1156_s2 = inlined_call_operand.vmem [shape: f32[3,8,8], index: 2, kind: input, shape index: {}]   ;;  %s1157_s3 = inlined_call_operand.vmem [shape: f32[8,1], index: 3, kind: input, shape index: {}]   ;;  %s1158_s4 = inlined_call_operand.vmem [shape: f32[8,1], index: 4, kind: input, shape index: {}]   ;;  %s1159_s5 = inlined_call_operand.hbm [shape: f32[8,256], index: 5, kind: output, shape index: {}]  }
   0x1   :  { %12 = vsyncpa [#allocation3 + $0x1], 0  ;;  %s1011_s18 = smov 0   ;;  %s1013_s19 = smov 0  }
   0x2   :  { %s1015_s20 = smov 0   ;;  %s1017_s21 = smov 0  }
   0x3 LB: > { %s1032_s22 = sadd.s32 4294967295, %s973_s21   ;;  %s799_s23 = sadd.s32 4294967294, %s973_s21   ;;  %s973_s21 = sphi %s1017_s21, %s1165_s21   ;;  %s969_s20 = sphi %s1015_s20, %s1164_s20   ;;  %s965_s19 = sphi %s1013_s19, %s1163_s19   ;;  %s961_s18 = sphi %s1011_s18, %s1162_s18  }
   0x4   : > { %s1036_s24 = sadd.s32 1, %s973_s21   ;;  %s135_s25 = sadd.s32 1, %s969_s20 }
   0x5   : > { %s132_s26 = ssub.s32 %s973_s21, %s1036_s24  ;;  %p145_p0 = scmp.ne.s32.totalorder %s969_s20, %s965_s19 }
   0x6   : > { %p133_p1 = scmp.eq.s32.totalorder %s132_s26, 0  ;;  %p146_p2 = scmp.eq.s32.totalorder %s1032_s22, 1 }
   0x7   : > { %p151_p3 = scmp.ne.s32.totalorder %s965_s19, %s961_s18  ;;  %p152_p4 = scmp.eq.s32.totalorder %s799_s23, 1 }
   0x8   : > { %s1047_s27 = scalar_select %p133_p1, %s969_s20, %s135_s25  }
   0x9   : > { %p1049_p5 = por %p146_p2, %p145_p0  ;;  %p1053_p6 = por %p152_p4, %p151_p3 }
   0xa   : > { %p802_p7 = scmp.ge.s32.totalorder %s973_s21, 1  ;;  %p189_p8 = scmp.lt.s32.totalorder %s973_s21, 3 }
   0xc   : > { %p190_p9 = pnand %p802_p7, %p189_p8 }
   0xd   : > { %p216_p10 = scmp.lt.s32.totalorder (!%p190_p9), %s1032_s22, 1  ;;  %v975_v0 = vmov (!%p190_p9), 0.0   ;;  %vm976_vm0 = vmmov (!%p190_p9), 0   ;;  %v461_v1 = vld [vmem:[%s1157_s3] sm:$0xff] (!%p190_p9)  ;;  %v977_v2 = vmov (!%p190_p9), 0   ;;  %vm232_vm1 = vcmask (!%p190_p9), 1043456  }
   0xe   : > { %193 = sbr.rel (%p190_p9) target bundleno = 715 (0x2cb), region = 40  ;;  %835 = vmatprep.subr.mxu0 (!%p190_p9), %v975_v0  ;;  %837 = vmatprep.mubr.msk.f32.mxu0 (!%p190_p9), %vm976_vm0, %v975_v0  ;;  %v805_v3 = vld [vmem:[%s1155_s1 + $0x8] sm:$0xff] (!%p190_p9)  ;;  %vm228_vm2 = vcmask (!%p190_p9), 31744   ;;  %s978_s14 = smov (!%p190_p9), 1   ;;  %v225_v5 = vld [vmem:[%s1155_s1] sm:$0xff] (!%p190_p9)  ;;  %v810_v7 = vld [vmem:[%s1155_s1 + $0x10] sm:$0xff] (!%p190_p9)  ;;  %v469_v12 = vlaneseq (!%p190_p9) }
   0xf   : > { %840 = vmatprep.subr.mxu1 (!%p190_p9), %v975_v0  ;;  %842 = vmatprep.mubr.msk.f32.mxu1 (!%p190_p9), %vm976_vm0, %v975_v0  ;;  %s979_s15 = smov (!%p190_p9), 127   ;;  %v813_v22 = vld [vmem:[%s1156_s2 + $0x8] sm:$0xff] (!%p190_p9)  ;;  %vm494_vm4 = vcmask (!%p190_p9), 64512   ;;  %v717_v24 = vld [vmem:[%s1158_s4] sm:$0xff] (!%p190_p9)  ;;  %v817_v26 = vld [vmem:[%s1156_s2 + $0x10] sm:$0xff] (!%p190_p9)  ;;  %s213_s12 = sand.u32 (!%p190_p9), 1, %s965_s19  }
  0x10   : > { %909 = vset.pattern.permute.xlu1 (!%p190_p9), %v977_v2  ;;  %910 = vset.pattern.permute.xlu0 (!%p190_p9), %v977_v2  ;;  %v470_v17 = vand.u32 (!%p190_p9), 127, %v469_v12  ;;  %v491_v25 = vld [vmem:[%s1156_s2] sm:$0xff] (!%p190_p9)  ;;  %s803_s13 = sshll.u32 (!%p190_p9), %s213_s12, 3  ;;  %s727_s26 = scalar_lea.sflag (!%p190_p9), [#allocation3], %s213_s12 }
  0x11   : > { %464 = vperm.xlu1 (!%p190_p9), %909, %v461_v1  }
  0x12   : > { %vm483_vm3 = vcmp.lt.s32.totalorder (!%p190_p9), %v470_v17, 16 }
  0x15   : > { %s217_s7 = scalar_select %p216_p10, %s1032_s22, 1 }
  0x17   : > { %s804_s8 = sshll.u32 %s217_s7, 2 }
  0x18   : > { %s219_s11 = scalar_lea.vmem %s1154_s0, %s804_s8 }
  0x19   : > { %v220_v4 = vld [vmem:[%s219_s11] sm:$0xf] }
  0x1a   : > { %221 = vrot.lane.b32.xlu0 %v220_v4, %s978_s14  ;;  %836 = vmatpush3.msk.msra.mxu0 %vm232_vm1, %v220_v4 }
  0x1b   : > { %838 = vmatmul.mubr.msk.f32.vlgmr.msra.gmra.mrb[0].mxu0 %vm228_vm2, %v805_v3  ;;  %845 = vmatprep.subr.mxu0 %v975_v0 }
  0x1c   : > { %847 = vmatprep.mubr.msk.f32.mxu0 %vm976_vm0, %v975_v0 }
  0x1e   : > { %223 = vrot.lane.b32.xlu0 %v220_v4, %s979_s15 }
  0x8c   : > { %v222_v6 = vpop.permute.xlu0 %221 }
  0x8d   : > { %841 = vmatpush3.msk.msra.mxu1 %vm232_vm1, %v222_v6 }
  0x8e   : > { %843 = vmatmul.mubr.msk.f32.vlgmr.msra.gmra.mrb[0].mxu1 %vm228_vm2, %v225_v5  ;;  %850 = vmatprep.subr.mxu1 %v975_v0 }
  0x8f   : > { %852 = vmatprep.mubr.msk.f32.mxu1 %vm976_vm0, %v975_v0 }
  0x90   : > { %v224_v8 = vpop.permute.xlu0 %223  ;;  %v465_v16 = vpop.permute.xlu1 %464 }
  0x91   : > { %846 = vmatpush3.msk.msra.mxu0 %vm232_vm1, %v224_v8 }
  0x92   : > { %848 = vmatmul.mubr.msk.f32.vlgmr.msra.gmra.mrb[2].mxu0 %vm228_vm2, %v810_v7  ;;  %855 = vmatprep.subr.mxu0 %v975_v0 }
  0x93   : > { %857 = vmatprep.mubr.msk.f32.mxu0 %vm976_vm0, %v975_v0 }
  0xee   : > { %v302_v9 = vpop.f32.mrb[0].mxu0 }
  0xef   : > { %v839_v10 = vpop.f32.mrb[1].mxu0 }
 0x161   : > { %v378_v11 = vpop.f32.mrb[0].mxu1 }
 0x162   : > { %v379_v13 = vadd.f32 %v378_v11, %v302_v9  ;;  %v844_v14 = vpop.f32.mrb[1].mxu1 }
 0x165   : > { %v456_v15 = vpop.f32.mrb[2].mxu0 }
 0x166   : > { %v460_v18 = vadd.f32 %v456_v15, %v379_v13  ;;  %v849_v19 = vpop.f32.mrb[3].mxu0 }
 0x168   : > { %v467_v20 = vadd.f32 %v465_v16, %v460_v18 }
 0x16a   : > { %v468_v21 = vmax.f32 %v467_v20, 0.0 }
 0x16c   : > { %851 = vmatpush3.msk.msra.mxu1 %vm483_vm3, %v468_v21  ;;  %v486_v23 = vsel %vm483_vm3, %v468_v21, 0.0 }
 0x16d   : > { %489 = vrot.lane.b32.xlu0 %v486_v23, %s979_s15  ;;  %487 = vrot.lane.b32.xlu1 %v486_v23, %s978_s14  ;;  %s820_s14 = sshll.u32 %s1032_s22, 7  ;;  %s215_s15 = scalar_lea.vmem [#allocation2], %s803_s13 }
 0x16e   : > { %853 = vmatmul.mubr.msk.f32.vlgmr.msra.gmra.mrb[2].mxu1 %vm494_vm4, %v813_v22  ;;  %860 = vmatprep.subr.mxu1 %v975_v0  ;;  %s740_s16 = sshll.u32 %s215_s15, 4  ;;  %s1112_s25 = scalar_lea.hbm %s1159_s5, %s820_s14  ;;  %s1114_s16 = int_to_ptr.vmem [resolvable:$true] %s740_s16 }
 0x16f   : > { %862 = vmatprep.mubr.msk.f32.mxu1 %vm976_vm0, %v975_v0  ;;  %s911_s30 = scalar_lea.vmem %s1114_s16, 128  ;;  %s980_s22 = smov [#allocation2]  }
 0x170   : > { %p912_p11 = scmp.ne.s32.totalorder %s1114_s16, %s911_s30  ;;  %s915_s6 = sshll.u32 %s980_s22, 4  ;;  %s916_s6 = int_to_ptr.vmem [resolvable:$false] %s915_s6 }
 0x171   : > { %720 = vperm.xlu1 %909, %v717_v24   ;;  %s917_s7 = scalar_lea.vmem %s916_s6, 256  ;;  %p918_p0 = scmp.lt.s32.totalorder %s1114_s16, %s916_s6 }
 0x172   : > { %p913_p12 = pnand %p912_p11, %p1049_p5  ;;  %p919_p1 = scmp.lt.s32.totalorder %s917_s7, %s911_s30 }
 0x174   : > { %p914_p13 = pneg %p913_p12  ;;  %p920_p2 = por %p919_p1, %p918_p0 }
 0x176   : > { %p921_p3 = pnand %p920_p2, %p914_p13 }
 0x1df   : > { %v490_v27 = vpop.permute.xlu0 %489  ;;  %v488_v28 = vpop.permute.xlu1 %487 }
 0x1e0   : > { %856 = vmatpush3.msra.mxu0 %v488_v28  ;;  %861 = vmatpush3.msra.mxu1 %v490_v27 }
 0x1e1   : > { %858 = vmatmul.mubr.msk.f32.vlgmr.msra.gmra.mrb[4].mxu0 %vm494_vm4, %v491_v25  ;;  %863 = vmatmul.mubr.msk.f32.vlgmr.msra.gmra.mrb[4].mxu1 %vm494_vm4, %v817_v26 }
 0x1f0   : > { %v721_v37 = vpop.permute.xlu1 %720 }
 0x241   : > { %v564_v29 = vpop.f32.mrb[2].mxu1 }
 0x242   : > { %v854_v30 = vpop.f32.mrb[3].mxu1 }
 0x2b4   : > { %v637_v31 = vpop.f32.mrb[4].mxu0  ;;  %v712_v32 = vpop.f32.mrb[4].mxu1 }
 0x2b5   : > { %v638_v33 = vadd.f32 %v637_v31, %v564_v29  ;;  %v859_v34 = vpop.f32.mrb[5].mxu0  ;;  %v864_v35 = vpop.f32.mrb[5].mxu1 }
 0x2b7   : > { %v716_v36 = vadd.f32 %v712_v32, %v638_v33 }
 0x2b9   : > { %v723_v38 = vadd.f32 %v721_v37, %v716_v36 }
 0x2bb   : > { %v724_v39 = vmax.f32 %v723_v38, 0.0 }
 0x2bd   : > { %725 = vst [vmem:[%s215_s15] sm:$0xff] %v724_v39 }
 0x2be   : > { %924 = shalt.err (!%p921_p3)
}
 0x2bf   : > { %s925_s8 = scalar_lea.hbm %s1112_s25, 128  ;;  %s929_s11 = scalar_lea.hbm %s1159_s5, 256 }
 0x2c0   : > { %p926_p4 = scmp.ne.s32.totalorder %s1112_s25, %s925_s8  ;;  %p930_p9 = scmp.lt.u32.totalorder %s1112_s25, %s1159_s5 }
 0x2c1   : > { %p931_p10 = scmp.lt.u32.totalorder %s929_s11, %s925_s8  ;;  %p933_p12 = scmp.lt.u32.totalorder %s925_s8, %s1112_s25 }
 0x2c2   : > { %p927_p7 = pnand %p926_p4, %p1049_p5 }
 0x2c3   : > { %p932_p11 = por %p931_p10, %p930_p9 }
 0x2c4   : > { %p928_p8 = pneg %p927_p7 }
 0x2c5   : > { %p934_p13 = por %p933_p12, %p932_p11 }
 0x2c7   : > { %p935_p0 = pnand %p934_p13, %p928_p8 }
 0x2c9   : > { %938 = shalt.err (!%p935_p0)
}
 0x2ca   : > { %865 = dma.vmem_to_hbm [thread:$0]  (%p1049_p5), %s1114_s16, 128, %s1112_s25, %s727_s26  }
 0x2cb PF: > { %p871_p1 = scmp.ge.s32.totalorder %s973_s21, 2  ;;  %s752_s14 = sand.u32 1, %s961_s18  }
 0x2cc   : > { %s753_s15 = scalar_lea.sflag [#allocation3], %s752_s14 }
 0x2cd   : > { %p868_p2 = pnand %p871_p1, %p1053_p6 }
 0x2cf   : > { %956 = dma.done.wait (!%p868_p2), %s753_s15, 128  }
 0x2d0   : > { %958 = vsyncadd (!%p868_p2), %s753_s15, 4294967168  ;;  %p15_p3 = scmp.ge.s32.totalorder %s1036_s24, 4   ;;  %s1162_s18 = smov %s965_s19 }
 0x2d1   : > { %s1163_s19 = smov %s969_s20  ;;  %s1164_s20 = smov %s1047_s27 }
 0x2d2   : > { %s1165_s21 = smov %s1036_s24  ;;  %17 = sbr.rel (!%p15_p3) target bundleno = 3 (0x3), region = 79 }
 0x2d9   :  { %758 = vsyncpa [#allocation3], 1 }
 0x2da   :  { %760 = vsyncpa [#allocation3 + $0x1], 1 }

</bundles_post_ra>
